<compile_context>
chip_gen: v6e
topology: v6e:2x2x1
jax: 0.10.0
libtpu: 0.0.40
codegen_flags: <defaults>
</compile_context>

<pallas_src>
import jax
import jax.numpy as jnp
from jax.experimental import pallas as pl
from jax.experimental.pallas import tpu as pltpu


def _round_up(n: int, m: int) -> int:
    return ((n + m - 1) // m) * m


def _vae_kernel(x_ref, eps_ref,
                w1e_ref, b1e_ref, wmu_ref, bmu_ref, wlv_ref, blv_ref,
                w1d_ref, b1d_ref, w2d_ref, b2d_ref,
                xr_ref, mu_ref, lv_ref):
    # ----- Encoder: h = relu(x @ W1e + b1e) -----
    x = x_ref[...]
    h = jnp.dot(x, w1e_ref[...], preferred_element_type=jnp.float32)
    h = jnp.maximum(h + b1e_ref[...], 0.0)              # f32 elementwise
    h_c = h.astype(wmu_ref.dtype)

    mu = jnp.dot(h_c, wmu_ref[...],
                 preferred_element_type=jnp.float32) + bmu_ref[...]
    logvar = jnp.dot(h_c, wlv_ref[...],
                     preferred_element_type=jnp.float32) + blv_ref[...]

    # ----- Reparameterize: z = mu + eps * exp(0.5 * logvar) -----
    z = mu + eps_ref[...].astype(jnp.float32) * jnp.exp(0.5 * logvar)

    # ----- Decoder: xr = sigmoid(relu(z @ W1d + b1d) @ W2d + b2d) -----
    hd = jnp.dot(z.astype(w1d_ref.dtype), w1d_ref[...],
                 preferred_element_type=jnp.float32)
    hd = jnp.maximum(hd + b1d_ref[...], 0.0)
    o = jnp.dot(hd.astype(w2d_ref.dtype), w2d_ref[...],
                preferred_element_type=jnp.float32)
    o = jax.nn.sigmoid(o + b2d_ref[...])                 # EUP exp + recip

    xr_ref[...] = o.astype(xr_ref.dtype)
    mu_ref[...] = mu.astype(mu_ref.dtype)
    lv_ref[...] = logvar.astype(lv_ref.dtype)


def vae_forward(x, eps, params, *, tile_b=128, matmul_dtype=None):
    """Fused VAE forward.

    x      : (B, input_dim)  f32
    eps    : (B, z_dim)      f32 standard-normal noise (torch.randn_like eps)
    params : (w1e, b1e, wmu, bmu, wlv, blv, w1d, b1d, w2d, b2d)
             weights are (in, out); biases are (1, out); all f32.
    matmul_dtype : optional jnp.bfloat16 to run MXU operands in bf16
                   (f32 accumulation / elementwise kept).
    returns (x_reconstructed (B, out), mu (B, z), logvar (B, z)), all f32.
    """
    (w1e, b1e, wmu, bmu, wlv, blv, w1d, b1d, w2d, b2d) = params

    B, D = x.shape
    H = w1e.shape[1]
    Z = wmu.shape[1]
    O = w2d.shape[1]

    # Lane-dense padding (multiples of 128 on feature dims). Zero padding keeps
    # the valid region exact: padded hidden units are relu(0)=0 and padded
    # weight rows are 0, so they contribute nothing.
    Dp, Hp, Zp, Op = (_round_up(d, 128) for d in (D, H, Z, O))
    TB = min(tile_b, _round_up(B, 8))     # batch tile, multiple of 8 sublanes
    Bp = _round_up(B, TB)

    f32 = jnp.float32
    op_dtype = f32 if matmul_dtype is None else matmul_dtype

    def pad2(a, rows, cols, dtype):
        a = a.astype(dtype)
        return jnp.pad(a, ((0, rows - a.shape[0]), (0, cols - a.shape[1])))

    xp    = pad2(x,   Bp, Dp, op_dtype)
    epsp  = pad2(eps, Bp, Zp, op_dtype)
    w1e_p = pad2(w1e, Dp, Hp, op_dtype); b1e_p = pad2(b1e, 1, Hp, f32)
    wmu_p = pad2(wmu, Hp, Zp, op_dtype); bmu_p = pad2(bmu, 1, Zp, f32)
    wlv_p = pad2(wlv, Hp, Zp, op_dtype); blv_p = pad2(blv, 1, Zp, f32)
    w1d_p = pad2(w1d, Zp, Hp, op_dtype); b1d_p = pad2(b1d, 1, Hp, f32)
    w2d_p = pad2(w2d, Hp, Op, op_dtype); b2d_p = pad2(b2d, 1, Op, f32)

    grid = (Bp // TB,)

    def row_spec(cols):       # batch-tiled activations / outputs
        return pl.BlockSpec((TB, cols), lambda i: (i, 0))

    def const_spec(shape):    # weights/biases: same block every step (resident)
        return pl.BlockSpec(shape, lambda i: (0, 0))

    itemsize = jnp.dtype(op_dtype).itemsize
    flops = 2 * Bp * (Dp * Hp + 2 * Hp * Zp + Zp * Hp + Hp * Op)
    transcendentals = Bp * (Zp + Op)          # exp in reparam + sigmoid
    bytes_accessed = (
        itemsize * (Bp * Dp + Bp * Zp
                    + Dp * Hp + 2 * Hp * Zp + Zp * Hp + Hp * Op)
        + 4 * (2 * Hp + 2 * Zp + Op)          # biases (f32)
        + 4 * (Bp * Op + 2 * Bp * Zp))        # outputs (f32)

    xr, mu, lv = pl.pallas_call(
        _vae_kernel,
        out_shape=(jax.ShapeDtypeStruct((Bp, Op), f32),
                   jax.ShapeDtypeStruct((Bp, Zp), f32),
                   jax.ShapeDtypeStruct((Bp, Zp), f32)),
        grid_spec=pltpu.PrefetchScalarGridSpec(
            num_scalar_prefetch=0,
            grid=grid,
            in_specs=[
                row_spec(Dp),                                 # x tile
                row_spec(Zp),                                 # eps tile
                const_spec((Dp, Hp)), const_spec((1, Hp)),    # encoder fc1
                const_spec((Hp, Zp)), const_spec((1, Zp)),    # fc_mu
                const_spec((Hp, Zp)), const_spec((1, Zp)),    # fc_logvar
                const_spec((Zp, Hp)), const_spec((1, Hp)),    # decoder fc1
                const_spec((Hp, Op)), const_spec((1, Op)),    # decoder fc2
            ],
            out_specs=(row_spec(Op), row_spec(Zp), row_spec(Zp)),
        ),
        compiler_params=pltpu.CompilerParams(
            dimension_semantics=("parallel",)),               # 2-TC on v7x
        cost_estimate=pl.CostEstimate(
            flops=flops,
            transcendentals=transcendentals,
            bytes_accessed=bytes_accessed),
    )(xp, epsp,
      w1e_p, b1e_p, wmu_p, bmu_p, wlv_p, blv_p,
      w1d_p, b1d_p, w2d_p, b2d_p)

    return xr[:B, :O], mu[:B, :Z], lv[:B, :Z]


def init_vae_params(key, input_dim, hidden_dim, z_dim, output_dim):
    """nn.Linear-style init, U[-1/sqrt(fan_in), +1/sqrt(fan_in)], weights (in,out)."""
    def linear(k, fan_in, fan_out):
        kw, kb = jax.random.split(k)
        lim = 1.0 / jnp.sqrt(jnp.float32(fan_in))
        w = jax.random.uniform(kw, (fan_in, fan_out), jnp.float32, -lim, lim)
        b = jax.random.uniform(kb, (1, fan_out), jnp.float32, -lim, lim)
        return w, b

    ks = jax.random.split(key, 5)
    w1e, b1e = linear(ks[0], input_dim, hidden_dim)
    wmu, bmu = linear(ks[1], hidden_dim, z_dim)
    wlv, blv = linear(ks[2], hidden_dim, z_dim)
    w1d, b1d = linear(ks[3], z_dim, hidden_dim)
    w2d, b2d = linear(ks[4], hidden_dim, output_dim)
    return (w1e, b1e, wmu, bmu, wlv, blv, w1d, b1d, w2d, b2d)


def vae_reference(x, eps, params):
    (w1e, b1e, wmu, bmu, wlv, blv, w1d, b1d, w2d, b2d) = params
    h = jnp.maximum(x @ w1e + b1e, 0.0)
    mu = h @ wmu + bmu
    logvar = h @ wlv + blv
    z = mu + eps * jnp.exp(0.5 * logvar)
    hd = jnp.maximum(z @ w1d + b1d, 0.0)
    xr = jax.nn.sigmoid(hd @ w2d + b2d)
    return xr, mu, logvar


if __name__ == "__main__":
    key = jax.random.PRNGKey(0)
    B, input_dim, hidden_dim, z_dim, output_dim = 8, 64, 32, 8, 64

    kx, ke, kp = jax.random.split(key, 3)
    x = jax.random.normal(kx, (B, input_dim), dtype=jnp.float32)
    # The stochastic eps of torch.randn_like is supplied from the host so the
    # kernel forward stays deterministic and checkable.
    eps = jax.random.normal(ke, (B, z_dim), dtype=jnp.float32)
    params = init_vae_params(kp, input_dim, hidden_dim, z_dim, output_dim)

    xr, mu, lv = vae_forward(x, eps, params)
    (xr, mu, lv) = jax.block_until_ready((xr, mu, lv))

    xr_ref, mu_ref, lv_ref = vae_reference(x, eps, params)
    assert xr.shape == (B, output_dim)
    assert mu.shape == (B, z_dim) and lv.shape == (B, z_dim)
    assert jnp.allclose(xr, xr_ref, atol=1e-4, rtol=1e-4)
    assert jnp.allclose(mu, mu_ref, atol=1e-4, rtol=1e-4)
    assert jnp.allclose(lv, lv_ref, atol=1e-4, rtol=1e-4)

    print("KERNEL_OK")
</pallas_src>

<mosaic_0001>
module attributes {stable_mosaic.version = 11 : i64} {
  func.func @_vae_kernel(%arg0: i32, %arg1: memref<8x128xf32, #tpu.memory_space<vmem>>, %arg2: memref<8x128xf32, #tpu.memory_space<vmem>>, %arg3: memref<128x128xf32, #tpu.memory_space<vmem>>, %arg4: memref<1x128xf32, #tpu.memory_space<vmem>>, %arg5: memref<128x128xf32, #tpu.memory_space<vmem>>, %arg6: memref<1x128xf32, #tpu.memory_space<vmem>>, %arg7: memref<128x128xf32, #tpu.memory_space<vmem>>, %arg8: memref<1x128xf32, #tpu.memory_space<vmem>>, %arg9: memref<128x128xf32, #tpu.memory_space<vmem>>, %arg10: memref<1x128xf32, #tpu.memory_space<vmem>>, %arg11: memref<128x128xf32, #tpu.memory_space<vmem>>, %arg12: memref<1x128xf32, #tpu.memory_space<vmem>>, %arg13: memref<8x128xf32, #tpu.memory_space<vmem>>, %arg14: memref<8x128xf32, #tpu.memory_space<vmem>>, %arg15: memref<8x128xf32, #tpu.memory_space<vmem>>) attributes {dimension_semantics = [#tpu.dimension_semantics<parallel>], iteration_bounds = array<i64: 1>, scalar_prefetch = 0 : i64, scratch_operands = 0 : i64, tpu.core_type = #tpu.core_type<tc>, window_params = [{transform_indices = @transform_0, window_bounds = array<i64: 8, 128>}, {transform_indices = @transform_1, window_bounds = array<i64: 8, 128>}, {pipeline_mode = #tpu.pipeline_mode<synchronous>, transform_indices = @transform_2, window_bounds = array<i64: 128, 128>}, {pipeline_mode = #tpu.pipeline_mode<synchronous>, transform_indices = @transform_3, window_bounds = array<i64: 1, 128>}, {pipeline_mode = #tpu.pipeline_mode<synchronous>, transform_indices = @transform_4, window_bounds = array<i64: 128, 128>}, {pipeline_mode = #tpu.pipeline_mode<synchronous>, transform_indices = @transform_5, window_bounds = array<i64: 1, 128>}, {pipeline_mode = #tpu.pipeline_mode<synchronous>, transform_indices = @transform_6, window_bounds = array<i64: 128, 128>}, {pipeline_mode = #tpu.pipeline_mode<synchronous>, transform_indices = @transform_7, window_bounds = array<i64: 1, 128>}, {pipeline_mode = #tpu.pipeline_mode<synchronous>, transform_indices = @transform_8, window_bounds = array<i64: 128, 128>}, {pipeline_mode = #tpu.pipeline_mode<synchronous>, transform_indices = @transform_9, window_bounds = array<i64: 1, 128>}, {pipeline_mode = #tpu.pipeline_mode<synchronous>, transform_indices = @transform_10, window_bounds = array<i64: 128, 128>}, {pipeline_mode = #tpu.pipeline_mode<synchronous>, transform_indices = @transform_11, window_bounds = array<i64: 1, 128>}, {transform_indices = @transform_12, window_bounds = array<i64: 8, 128>}, {transform_indices = @transform_13, window_bounds = array<i64: 8, 128>}, {transform_indices = @transform_14, window_bounds = array<i64: 8, 128>}]} {
    %c0 = arith.constant 0 : index
    %c0_0 = arith.constant 0 : index
    %0 = vector.load %arg1[%c0, %c0_0] : memref<8x128xf32, #tpu.memory_space<vmem>>, vector<8x128xf32>
    %c0_1 = arith.constant 0 : index
    %c0_2 = arith.constant 0 : index
    %1 = vector.load %arg3[%c0_1, %c0_2] : memref<128x128xf32, #tpu.memory_space<vmem>>, vector<128x128xf32>
    %cst = arith.constant dense<0.000000e+00> : vector<8x128xf32>
    %2 = tpu.matmul %0, %1, %cst {dimension_numbers = #tpu.dot_dimension_numbers<[1], [0], [0], [1], [0, 0, 1, 1], [], []>} : vector<8x128xf32>, vector<128x128xf32>, vector<8x128xf32> -> vector<8x128xf32>
    %c0_3 = arith.constant 0 : index
    %c0_4 = arith.constant 0 : index
    %3 = vector.load %arg4[%c0_3, %c0_4] : memref<1x128xf32, #tpu.memory_space<vmem>>, vector<1x128xf32>
    %4 = vector.broadcast %3 : vector<1x128xf32> to vector<8x128xf32>
    %5 = arith.addf %2, %4 : vector<8x128xf32>
    %cst_5 = arith.constant 0.000000e+00 : f32
    %6 = vector.broadcast %cst_5 : f32 to vector<8x128xf32>
    %7 = arith.maximumf %5, %6 : vector<8x128xf32>
    %c0_6 = arith.constant 0 : index
    %c0_7 = arith.constant 0 : index
    %8 = vector.load %arg5[%c0_6, %c0_7] : memref<128x128xf32, #tpu.memory_space<vmem>>, vector<128x128xf32>
    %cst_8 = arith.constant dense<0.000000e+00> : vector<8x128xf32>
    %9 = tpu.matmul %7, %8, %cst_8 {dimension_numbers = #tpu.dot_dimension_numbers<[1], [0], [0], [1], [0, 0, 1, 1], [], []>} : vector<8x128xf32>, vector<128x128xf32>, vector<8x128xf32> -> vector<8x128xf32>
    %c0_9 = arith.constant 0 : index
    %c0_10 = arith.constant 0 : index
    %10 = vector.load %arg6[%c0_9, %c0_10] : memref<1x128xf32, #tpu.memory_space<vmem>>, vector<1x128xf32>
    %11 = vector.broadcast %10 : vector<1x128xf32> to vector<8x128xf32>
    %12 = arith.addf %9, %11 : vector<8x128xf32>
    %c0_11 = arith.constant 0 : index
    %c0_12 = arith.constant 0 : index
    %13 = vector.load %arg7[%c0_11, %c0_12] : memref<128x128xf32, #tpu.memory_space<vmem>>, vector<128x128xf32>
    %cst_13 = arith.constant dense<0.000000e+00> : vector<8x128xf32>
    %14 = tpu.matmul %7, %13, %cst_13 {dimension_numbers = #tpu.dot_dimension_numbers<[1], [0], [0], [1], [0, 0, 1, 1], [], []>} : vector<8x128xf32>, vector<128x128xf32>, vector<8x128xf32> -> vector<8x128xf32>
    %c0_14 = arith.constant 0 : index
    %c0_15 = arith.constant 0 : index
    %15 = vector.load %arg8[%c0_14, %c0_15] : memref<1x128xf32, #tpu.memory_space<vmem>>, vector<1x128xf32>
    %16 = vector.broadcast %15 : vector<1x128xf32> to vector<8x128xf32>
    %17 = arith.addf %14, %16 : vector<8x128xf32>
    %c0_16 = arith.constant 0 : index
    %c0_17 = arith.constant 0 : index
    %18 = vector.load %arg2[%c0_16, %c0_17] : memref<8x128xf32, #tpu.memory_space<vmem>>, vector<8x128xf32>
    %cst_18 = arith.constant 5.000000e-01 : f32
    %19 = vector.broadcast %cst_18 : f32 to vector<8x128xf32>
    %20 = arith.mulf %19, %17 : vector<8x128xf32>
    %21 = math.exp %20 : vector<8x128xf32>
    %22 = arith.mulf %18, %21 : vector<8x128xf32>
    %23 = arith.addf %12, %22 : vector<8x128xf32>
    %c0_19 = arith.constant 0 : index
    %c0_20 = arith.constant 0 : index
    %24 = vector.load %arg9[%c0_19, %c0_20] : memref<128x128xf32, #tpu.memory_space<vmem>>, vector<128x128xf32>
    %cst_21 = arith.constant dense<0.000000e+00> : vector<8x128xf32>
    %25 = tpu.matmul %23, %24, %cst_21 {dimension_numbers = #tpu.dot_dimension_numbers<[1], [0], [0], [1], [0, 0, 1, 1], [], []>} : vector<8x128xf32>, vector<128x128xf32>, vector<8x128xf32> -> vector<8x128xf32>
    %c0_22 = arith.constant 0 : index
    %c0_23 = arith.constant 0 : index
    %26 = vector.load %arg10[%c0_22, %c0_23] : memref<1x128xf32, #tpu.memory_space<vmem>>, vector<1x128xf32>
    %27 = vector.broadcast %26 : vector<1x128xf32> to vector<8x128xf32>
    %28 = arith.addf %25, %27 : vector<8x128xf32>
    %cst_24 = arith.constant 0.000000e+00 : f32
    %29 = vector.broadcast %cst_24 : f32 to vector<8x128xf32>
    %30 = arith.maximumf %28, %29 : vector<8x128xf32>
    %c0_25 = arith.constant 0 : index
    %c0_26 = arith.constant 0 : index
    %31 = vector.load %arg11[%c0_25, %c0_26] : memref<128x128xf32, #tpu.memory_space<vmem>>, vector<128x128xf32>
    %cst_27 = arith.constant dense<0.000000e+00> : vector<8x128xf32>
    %32 = tpu.matmul %30, %31, %cst_27 {dimension_numbers = #tpu.dot_dimension_numbers<[1], [0], [0], [1], [0, 0, 1, 1], [], []>} : vector<8x128xf32>, vector<128x128xf32>, vector<8x128xf32> -> vector<8x128xf32>
    %c0_28 = arith.constant 0 : index
    %c0_29 = arith.constant 0 : index
    %33 = vector.load %arg12[%c0_28, %c0_29] : memref<1x128xf32, #tpu.memory_space<vmem>>, vector<1x128xf32>
    %34 = vector.broadcast %33 : vector<1x128xf32> to vector<8x128xf32>
    %35 = arith.addf %32, %34 : vector<8x128xf32>
    %36 = arith.negf %35 : vector<8x128xf32>
    %37 = math.exp %36 : vector<8x128xf32>
    %cst_30 = arith.constant 1.000000e+00 : f32
    %38 = vector.broadcast %cst_30 : f32 to vector<8x128xf32>
    %39 = arith.addf %38, %37 : vector<8x128xf32>
    %40 = arith.divf %38, %39 : vector<8x128xf32>
    %c0_31 = arith.constant 0 : index
    %c0_32 = arith.constant 0 : index
    %41 = vector.load %arg13[%c0_31, %c0_32] : memref<8x128xf32, #tpu.memory_space<vmem>>, vector<8x128xf32>
    tpu.vector_store %arg13[%c0_31, %c0_32], %40 {strides = array<i32>} : memref<8x128xf32, #tpu.memory_space<vmem>>, vector<8x128xf32>,
    %c0_33 = arith.constant 0 : index
    %c0_34 = arith.constant 0 : index
    %42 = vector.load %arg14[%c0_33, %c0_34] : memref<8x128xf32, #tpu.memory_space<vmem>>, vector<8x128xf32>
    tpu.vector_store %arg14[%c0_33, %c0_34], %12 {strides = array<i32>} : memref<8x128xf32, #tpu.memory_space<vmem>>, vector<8x128xf32>,
    %c0_35 = arith.constant 0 : index
    %c0_36 = arith.constant 0 : index
    %43 = vector.load %arg15[%c0_35, %c0_36] : memref<8x128xf32, #tpu.memory_space<vmem>>, vector<8x128xf32>
    tpu.vector_store %arg15[%c0_35, %c0_36], %17 {strides = array<i32>} : memref<8x128xf32, #tpu.memory_space<vmem>>, vector<8x128xf32>,
    return
  }
  func.func @transform_0(%arg0: i32) -> (i32, i32) {
    %c0_i32 = arith.constant 0 : i32
    %c0_i32_0 = arith.constant 0 : i32
    return %arg0, %c0_i32 : i32, i32
  }
  func.func @transform_1(%arg0: i32) -> (i32, i32) {
    %c0_i32 = arith.constant 0 : i32
    %c0_i32_0 = arith.constant 0 : i32
    return %arg0, %c0_i32 : i32, i32
  }
  func.func @transform_2(%arg0: i32) -> (i32, i32) {
    %c0_i32 = arith.constant 0 : i32
    %c0_i32_0 = arith.constant 0 : i32
    %c0_i32_1 = arith.constant 0 : i32
    return %c0_i32, %c0_i32_0 : i32, i32
  }
  func.func @transform_3(%arg0: i32) -> (i32, i32) {
    %c0_i32 = arith.constant 0 : i32
    %c0_i32_0 = arith.constant 0 : i32
    %c0_i32_1 = arith.constant 0 : i32
    return %c0_i32, %c0_i32_0 : i32, i32
  }
  func.func @transform_4(%arg0: i32) -> (i32, i32) {
    %c0_i32 = arith.constant 0 : i32
    %c0_i32_0 = arith.constant 0 : i32
    %c0_i32_1 = arith.constant 0 : i32
    return %c0_i32, %c0_i32_0 : i32, i32
  }
  func.func @transform_5(%arg0: i32) -> (i32, i32) {
    %c0_i32 = arith.constant 0 : i32
    %c0_i32_0 = arith.constant 0 : i32
    %c0_i32_1 = arith.constant 0 : i32
    return %c0_i32, %c0_i32_0 : i32, i32
  }
  func.func @transform_6(%arg0: i32) -> (i32, i32) {
    %c0_i32 = arith.constant 0 : i32
    %c0_i32_0 = arith.constant 0 : i32
    %c0_i32_1 = arith.constant 0 : i32
    return %c0_i32, %c0_i32_0 : i32, i32
  }
  func.func @transform_7(%arg0: i32) -> (i32, i32) {
    %c0_i32 = arith.constant 0 : i32
    %c0_i32_0 = arith.constant 0 : i32
    %c0_i32_1 = arith.constant 0 : i32
    return %c0_i32, %c0_i32_0 : i32, i32
  }
  func.func @transform_8(%arg0: i32) -> (i32, i32) {
    %c0_i32 = arith.constant 0 : i32
    %c0_i32_0 = arith.constant 0 : i32
    %c0_i32_1 = arith.constant 0 : i32
    return %c0_i32, %c0_i32_0 : i32, i32
  }
  func.func @transform_9(%arg0: i32) -> (i32, i32) {
    %c0_i32 = arith.constant 0 : i32
    %c0_i32_0 = arith.constant 0 : i32
    %c0_i32_1 = arith.constant 0 : i32
    return %c0_i32, %c0_i32_0 : i32, i32
  }
  func.func @transform_10(%arg0: i32) -> (i32, i32) {
    %c0_i32 = arith.constant 0 : i32
    %c0_i32_0 = arith.constant 0 : i32
    %c0_i32_1 = arith.constant 0 : i32
    return %c0_i32, %c0_i32_0 : i32, i32
  }
  func.func @transform_11(%arg0: i32) -> (i32, i32) {
    %c0_i32 = arith.constant 0 : i32
    %c0_i32_0 = arith.constant 0 : i32
    %c0_i32_1 = arith.constant 0 : i32
    return %c0_i32, %c0_i32_0 : i32, i32
  }
  func.func @transform_12(%arg0: i32) -> (i32, i32) {
    %c0_i32 = arith.constant 0 : i32
    %c0_i32_0 = arith.constant 0 : i32
    return %arg0, %c0_i32 : i32, i32
  }
  func.func @transform_13(%arg0: i32) -> (i32, i32) {
    %c0_i32 = arith.constant 0 : i32
    %c0_i32_0 = arith.constant 0 : i32
    return %arg0, %c0_i32 : i32, i32
  }
  func.func @transform_14(%arg0: i32) -> (i32, i32) {
    %c0_i32 = arith.constant 0 : i32
    %c0_i32_0 = arith.constant 0 : i32
    return %arg0, %c0_i32 : i32, i32
  }
}

</mosaic_0001>

<bundles_post_ra>
// kernel: tpu_custom_call.1
= control target key start
LH: loop header
LB: loop body
LE: loop exit
PB: predicated region body
PF: predicated region fallthrough
CT: control target
= control target key end

     0   :  { %20 = vsyncpa [#allocation3], 0  ;;  %s1402_s0 = inlined_call_operand.hbm [shape: f32[8,128], index: 0, kind: input, shape index: {}]   ;;  %s1403_s1 = inlined_call_operand.hbm [shape: f32[8,128], index: 1, kind: input, shape index: {}]   ;;  %s1404_s2 = inlined_call_operand.hbm [shape: f32[128,128], index: 2, kind: input, shape index: {}]   ;;  %s1405_s3 = inlined_call_operand.vmem [shape: f32[1,128], index: 3, kind: input, shape index: {}]   ;;  %s1406_s4 = inlined_call_operand.hbm [shape: f32[128,128], index: 4, kind: input, shape index: {}]   ;;  %s1407_s5 = inlined_call_operand.vmem [shape: f32[1,128], index: 5, kind: input, shape index: {}]   ;;  %s1408_s6 = inlined_call_operand.hbm [shape: f32[128,128], index: 6, kind: input, shape index: {}]   ;;  %s1409_s7 = inlined_call_operand.vmem [shape: f32[1,128], index: 7, kind: input, shape index: {}]   ;;  %s1410_s8 = inlined_call_operand.hbm [shape: f32[128,128], index: 8, kind: input, shape index: {}]   ;;  %s1411_s9 = inlined_call_operand.vmem [shape: f32[1,128], index: 9, kind: input, shape index: {}]   ;;  %s1412_s10 = inlined_call_operand.hbm [shape: f32[128,128], index: 10, kind: input, shape index: {}]   ;;  %s1413_s11 = inlined_call_operand.vmem [shape: f32[1,128], index: 11, kind: input, shape index: {}]   ;;  %s1414_s12 = inlined_call_operand.hbm [shape: f32[8,128], index: 12, kind: output, shape index: {0}]   ;;  %s1415_s13 = inlined_call_operand.hbm [shape: f32[8,128], index: 13, kind: output, shape index: {1}]   ;;  %s1416_s14 = inlined_call_operand.hbm [shape: f32[8,128], index: 14, kind: output, shape index: {2}]  }
   0x1   :  { %21 = vsyncpa [#allocation6], 0 }
   0x2   :  { %22 = vsyncpa [#allocation9], 0 }
   0x3   :  { %23 = vsyncpa [#allocation12], 0 }
   0x4   :  { %24 = vsyncpa [#allocation4], 0 }
   0x5   :  { %25 = vsyncpa [#allocation16], 0  ;;  %s1163_s29 = smov [#allocation5]  }
   0x6   :  { %s42_s30 = sshll.u32 %s1163_s29, 4  ;;  %s43_s30 = int_to_ptr.vmem [resolvable:$true] %s42_s30 }
   0x7   :  { %s959_s15 = scalar_lea.vmem %s43_s30, 128  ;;  %p964_p1 = scmp.lt.s32.totalorder %s43_s30, %s43_s30 }
   0x8   :  { %p960_p0 = scmp.ne.s32.totalorder %s43_s30, %s959_s15  ;;  %p965_p2 = scmp.lt.s32.totalorder %s959_s15, %s959_s15 }
   0xa   :  { %p966_p3 = por %p965_p2, %p964_p1 }
   0xc   :  { %p967_p4 = pnand %p966_p3, %p960_p0 }
   0xe   :  { %970 = shalt.err (!%p967_p4)
}
   0xf   :  { %45 = dma.hbm_to_vmem [thread:$0]  %s1403_s1, 128, %s43_s30, [#allocation6]  }
  0x10   :  { %s1164_s18 = smov [#allocation8]   ;;  %s1165_s20 = smov [#allocation11]  }
  0x11   :  { %s65_s19 = sshll.u32 %s1164_s18, 4  ;;  %s93_s21 = sshll.u32 %s1165_s20, 4  ;;  %s66_s19 = int_to_ptr.vmem [resolvable:$true] %s65_s19  ;;  %s94_s21 = int_to_ptr.vmem [resolvable:$true] %s93_s21 }
  0x12   :  { %s979_s22 = scalar_lea.vmem %s66_s19, 2048  ;;  %p984_p6 = scmp.lt.s32.totalorder %s66_s19, %s66_s19 }
  0x13   :  { %p980_p5 = scmp.ne.s32.totalorder %s66_s19, %s979_s22  ;;  %p985_p7 = scmp.lt.s32.totalorder %s979_s22, %s979_s22 }
  0x15   :  { %p986_p8 = por %p985_p7, %p984_p6 }
  0x17   :  { %p987_p9 = pnand %p986_p8, %p980_p5 }
  0x19   :  { %990 = shalt.err (!%p987_p9)
}
  0x1a   :  { %s1166_s23 = smov 128   ;;  %s1167_s24 = smov 8  }
  0x1b   :  { %71 = dma.hbm_to_vmem [thread:$0]  %s1406_s4, 2048, %s66_s19, [#allocation9], %s1166_s23, %s1166_s23, %s1167_s24  }
  0x1c   :  { %s999_s1 = scalar_lea.vmem %s94_s21, 2048  ;;  %p1004_p11 = scmp.lt.s32.totalorder %s94_s21, %s94_s21 }
  0x1d   :  { %p1000_p10 = scmp.ne.s32.totalorder %s94_s21, %s999_s1  ;;  %p1005_p12 = scmp.lt.s32.totalorder %s999_s1, %s999_s1 }
  0x1f   :  { %p1006_p13 = por %p1005_p12, %p1004_p11 }
  0x21   :  { %p1007_p0 = pnand %p1006_p13, %p1000_p10 }
  0x23   :  { %1010 = shalt.err (!%p1007_p0)
}
  0x24   :  { %99 = dma.hbm_to_vmem [thread:$0]  %s1410_s8, 2048, %s94_s21, [#allocation12], %s1166_s23, %s1166_s23, %s1167_s24  }
  0x25   :  { %s1168_s29 = smov [#allocation2]   ;;  %s1169_s15 = smov [#allocation7]  }
  0x26   :  { %s32_s30 = sshll.u32 %s1168_s29, 4  ;;  %s51_s4 = sshll.u32 %s1169_s15, 4  ;;  %s33_s30 = int_to_ptr.vmem [resolvable:$true] %s32_s30  ;;  %s52_s4 = int_to_ptr.vmem [resolvable:$true] %s51_s4 }
  0x27   :  { %s1019_s16 = scalar_lea.vmem %s33_s30, 128  ;;  %p1024_p2 = scmp.lt.s32.totalorder %s33_s30, %s33_s30 }
  0x28   :  { %p1020_p1 = scmp.ne.s32.totalorder %s33_s30, %s1019_s16  ;;  %p1025_p3 = scmp.lt.s32.totalorder %s1019_s16, %s1019_s16 }
  0x2a   :  { %p1026_p4 = por %p1025_p3, %p1024_p2 }
  0x2c   :  { %p1027_p5 = pnand %p1026_p4, %p1020_p1 }
  0x2e   :  { %1030 = shalt.err (!%p1027_p5)
}
  0x2f   :  { %35 = dma.hbm_to_vmem [thread:$0]  %s1402_s0, 128, %s33_s30, [#allocation3]  }
  0x30   :  { %s1039_s19 = scalar_lea.vmem %s52_s4, 2048  ;;  %p1044_p7 = scmp.lt.s32.totalorder %s52_s4, %s52_s4 }
  0x31   :  { %p1040_p6 = scmp.ne.s32.totalorder %s52_s4, %s1039_s19  ;;  %p1045_p8 = scmp.lt.s32.totalorder %s1039_s19, %s1039_s19 }
  0x33   :  { %p1046_p9 = por %p1045_p8, %p1044_p7 }
  0x35   :  { %p1047_p10 = pnand %p1046_p9, %p1040_p6 }
  0x37   :  { %1050 = shalt.err (!%p1047_p10)
}
  0x38   :  { %57 = dma.hbm_to_vmem [thread:$0]  %s1404_s2, 2048, %s52_s4, [#allocation6], %s1166_s23, %s1166_s23, %s1167_s24  }
  0x39   :  { %s1170_s21 = smov [#allocation10]   ;;  %s1171_s25 = smov [#allocation13]  }
  0x3a   :  { %s79_s22 = sshll.u32 %s1170_s21, 4  ;;  %s107_s0 = sshll.u32 %s1171_s25, 4  ;;  %s80_s22 = int_to_ptr.vmem [resolvable:$true] %s79_s22  ;;  %s108_s0 = int_to_ptr.vmem [resolvable:$true] %s107_s0 }
  0x3b   :  { %s1059_s26 = scalar_lea.vmem %s80_s22, 2048  ;;  %p1064_p12 = scmp.lt.s32.totalorder %s80_s22, %s80_s22 }
  0x3c   :  { %p1060_p11 = scmp.ne.s32.totalorder %s80_s22, %s1059_s26  ;;  %p1065_p13 = scmp.lt.s32.totalorder %s1059_s26, %s1059_s26 }
  0x3e   :  { %p1066_p0 = por %p1065_p13, %p1064_p12 }
  0x40   :  { %p1067_p1 = pnand %p1066_p0, %p1060_p11 }
  0x42   :  { %1070 = shalt.err (!%p1067_p1)
}
  0x43   :  { %85 = dma.hbm_to_vmem [thread:$0]  %s1408_s6, 2048, %s80_s22, [#allocation9], %s1166_s23, %s1166_s23, %s1167_s24  }
  0x44   :  { %s1079_s2 = scalar_lea.vmem %s108_s0, 2048  ;;  %p1084_p3 = scmp.lt.s32.totalorder %s108_s0, %s108_s0 }
  0x45   :  { %p1080_p2 = scmp.ne.s32.totalorder %s108_s0, %s1079_s2  ;;  %p1085_p4 = scmp.lt.s32.totalorder %s1079_s2, %s1079_s2 }
  0x47   :  { %p1086_p5 = por %p1085_p4, %p1084_p3 }
  0x49   :  { %p1087_p6 = pnand %p1086_p5, %p1080_p2 }
  0x4b   :  { %1090 = shalt.err (!%p1087_p6)
}
  0x4c   :  { %113 = dma.hbm_to_vmem [thread:$0]  %s1412_s10, 2048, %s108_s0, [#allocation12], %s1166_s23, %s1166_s23, %s1167_s24  }
  0x4d   :  { %1151 = dma.done.wait [#allocation3], 128  }
  0x4e   :  { %1152 = vsyncadd [#allocation3], 4294967168 }
  0x4f   :  { %1153 = dma.done.wait [#allocation6], 2176  }
  0x50   :  { %1154 = vsyncadd [#allocation6], 4294965120 }
  0x51   :  { %1155 = dma.done.wait [#allocation9], 4096  }
  0x52   :  { %1156 = vsyncadd [#allocation9], 4294963200 }
  0x53   :  { %1157 = dma.done.wait [#allocation12], 4096  }
  0x54   :  { %1158 = vsyncadd [#allocation12], 4294963200  ;;  %v1172_v0 = vmov 0.0   ;;  %vm1173_vm0 = vmmov 0   ;;  %v153_v1 = vld [vmem:[#allocation7 + $0x78] sm:$0xff]  ;;  %v152_v2 = vld [vmem:[#allocation7 + $0x70] sm:$0xff] }
  0x55   :  { %756 = vmatprep.subr.mxu0 %v1172_v0  ;;  %788 = vmatprep.mubr.msk.f32.mxu0 %vm1173_vm0, %v1172_v0  ;;  %v151_v3 = vld [vmem:[#allocation7 + $0x68] sm:$0xff]  ;;  %v150_v4 = vld [vmem:[#allocation7 + $0x60] sm:$0xff]  ;;  %v247_v5 = vld [vmem:[#allocation8 + $0x78] sm:$0xff]  ;;  %s1174_s15 = smov [#allocation15]  }
  0x56   :  { %791 = vmatprep.subr.mxu1 %v1172_v0  ;;  %823 = vmatprep.mubr.msk.f32.mxu1 %vm1173_vm0, %v1172_v0  ;;  %v149_v6 = vld [vmem:[#allocation7 + $0x58] sm:$0xff]  ;;  %v246_v7 = vld [vmem:[#allocation8 + $0x70] sm:$0xff]  ;;  %v245_v8 = vld [vmem:[#allocation8 + $0x68] sm:$0xff]  ;;  %s636_s4 = sshll.u32 %s1174_s15, 4  ;;  %s637_s4 = int_to_ptr.vmem [resolvable:$true] %s636_s4 }
  0x57   :  { %757 = vmatpush3.msra.mxu0 %v153_v1  ;;  %792 = vmatpush3.msra.mxu1 %v247_v5  ;;  %v148_v9 = vld [vmem:[#allocation7 + $0x50] sm:$0xff]  ;;  %v244_v10 = vld [vmem:[#allocation8 + $0x60] sm:$0xff]  ;;  %v147_v11 = vld [vmem:[#allocation7 + $0x48] sm:$0xff]  ;;  %s1091_s16 = scalar_lea.vmem %s637_s4, 128  ;;  %p1096_p8 = scmp.lt.s32.totalorder %s637_s4, %s637_s4 }
  0x58   :  { %758 = vmatprep.subr.mxu0 %v1172_v0  ;;  %793 = vmatprep.subr.mxu1 %v1172_v0  ;;  %v243_v12 = vld [vmem:[#allocation8 + $0x58] sm:$0xff]  ;;  %v146_v13 = vld [vmem:[#allocation7 + $0x40] sm:$0xff]  ;;  %v242_v14 = vld [vmem:[#allocation8 + $0x50] sm:$0xff]  ;;  %p1092_p7 = scmp.ne.s32.totalorder %s637_s4, %s1091_s16  ;;  %p1097_p9 = scmp.lt.s32.totalorder %s1091_s16, %s1091_s16 }
  0x59   :  { %759 = vmatpush3.msra.mxu0 %v152_v2  ;;  %794 = vmatpush3.msra.mxu1 %v246_v7  ;;  %v145_v15 = vld [vmem:[#allocation7 + $0x38] sm:$0xff]  ;;  %v241_v16 = vld [vmem:[#allocation8 + $0x48] sm:$0xff]  ;;  %v144_v17 = vld [vmem:[#allocation7 + $0x30] sm:$0xff] }
  0x5a   :  { %760 = vmatprep.subr.mxu0 %v1172_v0  ;;  %795 = vmatprep.subr.mxu1 %v1172_v0  ;;  %v240_v18 = vld [vmem:[#allocation8 + $0x40] sm:$0xff]  ;;  %v143_v19 = vld [vmem:[#allocation7 + $0x28] sm:$0xff]  ;;  %v239_v20 = vld [vmem:[#allocation8 + $0x38] sm:$0xff]  ;;  %p1098_p10 = por %p1097_p9, %p1096_p8 }
  0x5b   :  { %761 = vmatpush3.msra.mxu0 %v151_v3  ;;  %796 = vmatpush3.msra.mxu1 %v245_v8  ;;  %v142_v21 = vld [vmem:[#allocation7 + $0x20] sm:$0xff]  ;;  %v238_v22 = vld [vmem:[#allocation8 + $0x30] sm:$0xff]  ;;  %v141_v23 = vld [vmem:[#allocation7 + $0x18] sm:$0xff] }
  0x5c   :  { %762 = vmatprep.subr.mxu0 %v1172_v0  ;;  %797 = vmatprep.subr.mxu1 %v1172_v0  ;;  %v237_v24 = vld [vmem:[#allocation8 + $0x28] sm:$0xff]  ;;  %v140_v25 = vld [vmem:[#allocation7 + $0x10] sm:$0xff]  ;;  %v236_v26 = vld [vmem:[#allocation8 + $0x20] sm:$0xff]  ;;  %p1099_p11 = pnand %p1098_p10, %p1092_p7 }
  0x5d   :  { %763 = vmatpush3.msra.mxu0 %v150_v4  ;;  %798 = vmatpush3.msra.mxu1 %v244_v10  ;;  %v139_v27 = vld [vmem:[#allocation7 + $0x8] sm:$0xff]  ;;  %v235_v28 = vld [vmem:[#allocation8 + $0x18] sm:$0xff]  ;;  %v138_v29 = vld [vmem:[#allocation7] sm:$0xff] }
  0x5e   :  { %764 = vmatprep.subr.mxu0 %v1172_v0  ;;  %799 = vmatprep.subr.mxu1 %v1172_v0  ;;  %v137_v30 = vld [vmem:[#allocation2] sm:$0xff]  ;;  %v340_v31 = vld [vmem:[#allocation10 + $0x78] sm:$0xff]  ;;  %v338_v33 = vld [vmem:[#allocation10 + $0x68] sm:$0xff] }
  0x5f   :  { %765 = vmatpush3.msra.mxu0 %v149_v6  ;;  %800 = vmatpush3.msra.mxu1 %v243_v12  ;;  %v339_v32 = vld [vmem:[#allocation10 + $0x70] sm:$0xff]  ;;  %v337_v34 = vld [vmem:[#allocation10 + $0x60] sm:$0xff]  ;;  %v336_v35 = vld [vmem:[#allocation10 + $0x58] sm:$0xff] }
  0x60   :  { %766 = vmatprep.subr.mxu0 %v1172_v0  ;;  %801 = vmatprep.subr.mxu1 %v1172_v0  ;;  %v335_v36 = vld [vmem:[#allocation10 + $0x50] sm:$0xff]  ;;  %v334_v37 = vld [vmem:[#allocation10 + $0x48] sm:$0xff]  ;;  %v333_v38 = vld [vmem:[#allocation10 + $0x40] sm:$0xff] }
  0x61   :  { %767 = vmatpush3.msra.mxu0 %v148_v9  ;;  %802 = vmatpush3.msra.mxu1 %v242_v14  ;;  %v332_v39 = vld [vmem:[#allocation10 + $0x38] sm:$0xff]  ;;  %v331_v40 = vld [vmem:[#allocation10 + $0x30] sm:$0xff]  ;;  %v330_v41 = vld [vmem:[#allocation10 + $0x28] sm:$0xff] }
  0x62   :  { %768 = vmatprep.subr.mxu0 %v1172_v0  ;;  %803 = vmatprep.subr.mxu1 %v1172_v0  ;;  %v329_v42 = vld [vmem:[#allocation10 + $0x20] sm:$0xff]  ;;  %v328_v43 = vld [vmem:[#allocation10 + $0x18] sm:$0xff]  ;;  %v234_v44 = vld [vmem:[#allocation8 + $0x10] sm:$0xff] }
  0x63   :  { %769 = vmatpush3.msra.mxu0 %v147_v11  ;;  %804 = vmatpush3.msra.mxu1 %v241_v16  ;;  %v327_v45 = vld [vmem:[#allocation10 + $0x10] sm:$0xff]  ;;  %v233_v46 = vld [vmem:[#allocation8 + $0x8] sm:$0xff]  ;;  %v232_v48 = vld [vmem:[#allocation8] sm:$0xff] }
  0x64   :  { %770 = vmatprep.subr.mxu0 %v1172_v0  ;;  %805 = vmatprep.subr.mxu1 %v1172_v0  ;;  %v326_v47 = vld [vmem:[#allocation10 + $0x8] sm:$0xff]  ;;  %v325_v49 = vld [vmem:[#allocation10] sm:$0xff]  ;;  %v665_v50 = vld [vmem:[%s1405_s3] ss:$0 sm:$0xff] }
  0x65   :  { %771 = vmatpush3.msra.mxu0 %v146_v13  ;;  %806 = vmatpush3.msra.mxu1 %v240_v18  ;;  %v439_v55 = vld [vmem:[#allocation11 + $0x78] sm:$0xff]  ;;  %v438_v56 = vld [vmem:[#allocation11 + $0x70] sm:$0xff]  ;;  %v437_v57 = vld [vmem:[#allocation11 + $0x68] sm:$0xff] }
  0x66   :  { %772 = vmatprep.subr.mxu0 %v1172_v0  ;;  %807 = vmatprep.subr.mxu1 %v1172_v0  ;;  %v436_v58 = vld [vmem:[#allocation11 + $0x60] sm:$0xff]  ;;  %v435_v59 = vld [vmem:[#allocation11 + $0x58] sm:$0xff]  ;;  %v434_v60 = vld [vmem:[#allocation11 + $0x50] sm:$0xff] }
  0x67   :  { %773 = vmatpush3.msra.mxu0 %v145_v15  ;;  %808 = vmatpush3.msra.mxu1 %v239_v20  ;;  %v433_v61 = vld [vmem:[#allocation11 + $0x48] sm:$0xff]  ;;  %v432_v62 = vld [vmem:[#allocation11 + $0x40] sm:$0xff]  ;;  %v431_v63 = vld [vmem:[#allocation11 + $0x38] sm:$0xff] }
  0x68   :  { %774 = vmatprep.subr.mxu0 %v1172_v0  ;;  %809 = vmatprep.subr.mxu1 %v1172_v0  ;;  %v430_v1 = vld [vmem:[#allocation11 + $0x30] sm:$0xff]  ;;  %v429_v2 = vld [vmem:[#allocation11 + $0x28] sm:$0xff]  ;;  %v428_v3 = vld [vmem:[#allocation11 + $0x20] sm:$0xff] }
  0x69   :  { %775 = vmatpush3.msra.mxu0 %v144_v17  ;;  %810 = vmatpush3.msra.mxu1 %v238_v22  ;;  %v427_v4 = vld [vmem:[#allocation11 + $0x18] sm:$0xff]  ;;  %v426_v5 = vld [vmem:[#allocation11 + $0x10] sm:$0xff]  ;;  %v425_v6 = vld [vmem:[#allocation11 + $0x8] sm:$0xff] }
  0x6a   :  { %776 = vmatprep.subr.mxu0 %v1172_v0  ;;  %811 = vmatprep.subr.mxu1 %v1172_v0  ;;  %v424_v7 = vld [vmem:[#allocation11] sm:$0xff]  ;;  %v533_v8 = vld [vmem:[#allocation13 + $0x78] sm:$0xff]  ;;  %v532_v9 = vld [vmem:[#allocation13 + $0x70] sm:$0xff] }
  0x6b   :  { %777 = vmatpush3.msra.mxu0 %v143_v19  ;;  %812 = vmatpush3.msra.mxu1 %v237_v24  ;;  %v531_v10 = vld [vmem:[#allocation13 + $0x68] sm:$0xff]  ;;  %v530_v11 = vld [vmem:[#allocation13 + $0x60] sm:$0xff]  ;;  %v529_v12 = vld [vmem:[#allocation13 + $0x58] sm:$0xff] }
  0x6c   :  { %778 = vmatprep.subr.mxu0 %v1172_v0  ;;  %813 = vmatprep.subr.mxu1 %v1172_v0  ;;  %v528_v13 = vld [vmem:[#allocation13 + $0x50] sm:$0xff]  ;;  %v527_v14 = vld [vmem:[#allocation13 + $0x48] sm:$0xff]  ;;  %v526_v15 = vld [vmem:[#allocation13 + $0x40] sm:$0xff] }
  0x6d   :  { %779 = vmatpush3.msra.mxu0 %v142_v21  ;;  %814 = vmatpush3.msra.mxu1 %v236_v26  ;;  %v525_v16 = vld [vmem:[#allocation13 + $0x38] sm:$0xff]  ;;  %v524_v17 = vld [vmem:[#allocation13 + $0x30] sm:$0xff]  ;;  %v523_v18 = vld [vmem:[#allocation13 + $0x28] sm:$0xff] }
  0x6e   :  { %780 = vmatprep.subr.mxu0 %v1172_v0  ;;  %815 = vmatprep.subr.mxu1 %v1172_v0  ;;  %v522_v19 = vld [vmem:[#allocation13 + $0x20] sm:$0xff]  ;;  %v521_v20 = vld [vmem:[#allocation13 + $0x18] sm:$0xff]  ;;  %v666_v21 = vld [vmem:[%s1407_s5] ss:$0 sm:$0xff] }
  0x6f   :  { %781 = vmatpush3.msra.mxu0 %v141_v23  ;;  %816 = vmatpush3.msra.mxu1 %v235_v28  ;;  %v667_v22 = vld [vmem:[%s1409_s7] ss:$0 sm:$0xff] }
  0x70   :  { %782 = vmatprep.subr.mxu0 %v1172_v0  ;;  %817 = vmatprep.subr.mxu1 %v1172_v0 }
  0x71   :  { %783 = vmatpush3.msra.mxu0 %v140_v25  ;;  %818 = vmatpush3.msra.mxu1 %v234_v44 }
  0x72   :  { %784 = vmatprep.subr.mxu0 %v1172_v0  ;;  %819 = vmatprep.subr.mxu1 %v1172_v0 }
  0x73   :  { %785 = vmatpush3.msra.mxu0 %v139_v27  ;;  %820 = vmatpush3.msra.mxu1 %v233_v46 }
  0x74   :  { %786 = vmatprep.subr.mxu0 %v1172_v0  ;;  %821 = vmatprep.subr.mxu1 %v1172_v0 }
  0x75   :  { %787 = vmatpush3.msra.mxu0 %v138_v29  ;;  %822 = vmatpush3.msra.mxu1 %v232_v48 }
  0x76   :  { %789 = vmatmul.mubr.f32.vlgmr.msra.gmra.mxu0 %v137_v30  ;;  %826 = vmatprep.subr.mxu0 %v1172_v0 }
  0x77   :  { %827 = vmatpush3.msra.mxu0 %v340_v31  ;;  %858 = vmatprep.mubr.msk.f32.mxu0 %vm1173_vm0, %v1172_v0  ;;  %v418_v31 = vld [vmem:[#allocation5] sm:$0xff] }
  0x78   :  { %828 = vmatprep.subr.mxu0 %v1172_v0  ;;  %861 = vmatprep.subr.mxu1 %v1172_v0 }
  0x79   :  { %829 = vmatpush3.msra.mxu0 %v339_v32 }
  0x7a   :  { %830 = vmatprep.subr.mxu0 %v1172_v0 }
  0x7b   :  { %831 = vmatpush3.msra.mxu0 %v338_v33 }
  0x7c   :  { %832 = vmatprep.subr.mxu0 %v1172_v0 }
  0x7d   :  { %833 = vmatpush3.msra.mxu0 %v337_v34 }
  0x7e   :  { %834 = vmatprep.subr.mxu0 %v1172_v0 }
  0x7f   :  { %835 = vmatpush3.msra.mxu0 %v336_v35  ;;  %v520_v35 = vld [vmem:[#allocation13 + $0x10] sm:$0xff] }
  0x80   :  { %836 = vmatprep.subr.mxu0 %v1172_v0 }
  0x81   :  { %837 = vmatpush3.msra.mxu0 %v335_v36  ;;  %v519_v36 = vld [vmem:[#allocation13 + $0x8] sm:$0xff] }
  0x82   :  { %838 = vmatprep.subr.mxu0 %v1172_v0 }
  0x83   :  { %839 = vmatpush3.msra.mxu0 %v334_v37  ;;  %v518_v37 = vld [vmem:[#allocation13] sm:$0xff] }
  0x84   :  { %840 = vmatprep.subr.mxu0 %v1172_v0 }
  0x85   :  { %841 = vmatpush3.msra.mxu0 %v333_v38  ;;  %v668_v38 = vld [vmem:[%s1411_s9] ss:$0 sm:$0xff] }
  0x86   :  { %842 = vmatprep.subr.mxu0 %v1172_v0 }
  0x87   :  { %843 = vmatpush3.msra.mxu0 %v332_v39 }
  0x88   :  { %844 = vmatprep.subr.mxu0 %v1172_v0 }
  0x89   :  { %845 = vmatpush3.msra.mxu0 %v331_v40 }
  0x8a   :  { %846 = vmatprep.subr.mxu0 %v1172_v0 }
  0x8b   :  { %847 = vmatpush3.msra.mxu0 %v330_v41 }
  0x8c   :  { %848 = vmatprep.subr.mxu0 %v1172_v0 }
  0x8d   :  { %849 = vmatpush3.msra.mxu0 %v329_v42 }
  0x8e   :  { %850 = vmatprep.subr.mxu0 %v1172_v0 }
  0x8f   :  { %851 = vmatpush3.msra.mxu0 %v328_v43 }
  0x90   :  { %852 = vmatprep.subr.mxu0 %v1172_v0 }
  0x91   :  { %853 = vmatpush3.msra.mxu0 %v327_v45 }
  0x92   :  { %854 = vmatprep.subr.mxu0 %v1172_v0 }
  0x93   :  { %855 = vmatpush3.msra.mxu0 %v326_v47 }
  0x94   :  { %856 = vmatprep.subr.mxu0 %v1172_v0 }
  0x95   :  { %857 = vmatpush3.msra.mxu0 %v325_v49 }
  0x96   :  { %896 = vmatprep.subr.mxu0 %v1172_v0 }
 0x136   :  { %v227_v51 = vpop.f32.mrf.mxu0 }
 0x137   :  { %v228_v52 = vadd.f32 %v665_v50, %v227_v51 }
 0x138   :  { %v790_v53 = vpop.f32.mrf.mxu0 }
 0x139   :  { %v231_v54 = vmax.f32 %v228_v52, 0.0 }
 0x13b   :  { %824 = vmatmul.mubr.f32.vlgmr.msra.gmra.mxu1 %v231_v54  ;;  %859 = vmatmul.mubr.f32.vlgmr.msra.gmra.mxu0 %v231_v54 }
 0x13c   :  { %862 = vmatpush3.msra.mxu1 %v439_v55  ;;  %893 = vmatprep.mubr.msk.f32.mxu1 %vm1173_vm0, %v1172_v0 }
 0x13d   :  { %863 = vmatprep.subr.mxu1 %v1172_v0  ;;  %928 = vmatprep.mubr.msk.f32.mxu0 %vm1173_vm0, %v1172_v0 }
 0x13e   :  { %864 = vmatpush3.msra.mxu1 %v438_v56  ;;  %897 = vmatpush3.msra.mxu0 %v533_v8 }
 0x13f   :  { %865 = vmatprep.subr.mxu1 %v1172_v0  ;;  %898 = vmatprep.subr.mxu0 %v1172_v0 }
 0x140   :  { %866 = vmatpush3.msra.mxu1 %v437_v57  ;;  %899 = vmatpush3.msra.mxu0 %v532_v9 }
 0x141   :  { %867 = vmatprep.subr.mxu1 %v1172_v0  ;;  %900 = vmatprep.subr.mxu0 %v1172_v0 }
 0x142   :  { %868 = vmatpush3.msra.mxu1 %v436_v58  ;;  %901 = vmatpush3.msra.mxu0 %v531_v10 }
 0x143   :  { %869 = vmatprep.subr.mxu1 %v1172_v0  ;;  %902 = vmatprep.subr.mxu0 %v1172_v0 }
 0x144   :  { %870 = vmatpush3.msra.mxu1 %v435_v59  ;;  %903 = vmatpush3.msra.mxu0 %v530_v11 }
 0x145   :  { %871 = vmatprep.subr.mxu1 %v1172_v0  ;;  %904 = vmatprep.subr.mxu0 %v1172_v0 }
 0x146   :  { %872 = vmatpush3.msra.mxu1 %v434_v60  ;;  %905 = vmatpush3.msra.mxu0 %v529_v12 }
 0x147   :  { %873 = vmatprep.subr.mxu1 %v1172_v0  ;;  %906 = vmatprep.subr.mxu0 %v1172_v0 }
 0x148   :  { %874 = vmatpush3.msra.mxu1 %v433_v61  ;;  %907 = vmatpush3.msra.mxu0 %v528_v13 }
 0x149   :  { %875 = vmatprep.subr.mxu1 %v1172_v0  ;;  %908 = vmatprep.subr.mxu0 %v1172_v0 }
 0x14a   :  { %876 = vmatpush3.msra.mxu1 %v432_v62  ;;  %909 = vmatpush3.msra.mxu0 %v527_v14 }
 0x14b   :  { %877 = vmatprep.subr.mxu1 %v1172_v0  ;;  %910 = vmatprep.subr.mxu0 %v1172_v0 }
 0x14c   :  { %878 = vmatpush3.msra.mxu1 %v431_v63  ;;  %911 = vmatpush3.msra.mxu0 %v526_v15 }
 0x14d   :  { %879 = vmatprep.subr.mxu1 %v1172_v0  ;;  %912 = vmatprep.subr.mxu0 %v1172_v0 }
 0x14e   :  { %880 = vmatpush3.msra.mxu1 %v430_v1  ;;  %913 = vmatpush3.msra.mxu0 %v525_v16 }
 0x14f   :  { %881 = vmatprep.subr.mxu1 %v1172_v0  ;;  %914 = vmatprep.subr.mxu0 %v1172_v0 }
 0x150   :  { %882 = vmatpush3.msra.mxu1 %v429_v2  ;;  %915 = vmatpush3.msra.mxu0 %v524_v17 }
 0x151   :  { %883 = vmatprep.subr.mxu1 %v1172_v0  ;;  %916 = vmatprep.subr.mxu0 %v1172_v0 }
 0x152   :  { %884 = vmatpush3.msra.mxu1 %v428_v3  ;;  %917 = vmatpush3.msra.mxu0 %v523_v18 }
 0x153   :  { %885 = vmatprep.subr.mxu1 %v1172_v0  ;;  %918 = vmatprep.subr.mxu0 %v1172_v0 }
 0x154   :  { %886 = vmatpush3.msra.mxu1 %v427_v4  ;;  %919 = vmatpush3.msra.mxu0 %v522_v19 }
 0x155   :  { %887 = vmatprep.subr.mxu1 %v1172_v0  ;;  %920 = vmatprep.subr.mxu0 %v1172_v0 }
 0x156   :  { %888 = vmatpush3.msra.mxu1 %v426_v5  ;;  %921 = vmatpush3.msra.mxu0 %v521_v20 }
 0x157   :  { %889 = vmatprep.subr.mxu1 %v1172_v0  ;;  %922 = vmatprep.subr.mxu0 %v1172_v0 }
 0x158   :  { %890 = vmatpush3.msra.mxu1 %v425_v6  ;;  %923 = vmatpush3.msra.mxu0 %v520_v35 }
 0x159   :  { %891 = vmatprep.subr.mxu1 %v1172_v0  ;;  %924 = vmatprep.subr.mxu0 %v1172_v0 }
 0x15a   :  { %892 = vmatpush3.msra.mxu1 %v424_v7  ;;  %925 = vmatpush3.msra.mxu0 %v519_v36 }
 0x15b   :  { %926 = vmatprep.subr.mxu0 %v1172_v0 }
 0x15c   :  { %927 = vmatpush3.msra.mxu0 %v518_v37 }
 0x1fb   :  { %v321_v23 = vpop.f32.mrf.mxu1  ;;  %v414_v24 = vpop.f32.mrf.mxu0 }
 0x1fc   :  { %v322_v25 = vadd.f32 %v666_v21, %v321_v23  ;;  %v415_v26 = vadd.f32 %v667_v22, %v414_v24 }
 0x1fd   :  { %v825_v27 = vpop.f32.mrf.mxu1  ;;  %v860_v28 = vpop.f32.mrf.mxu0 }
 0x1fe   :  { %618 = vst [vmem:[#allocation15] sm:$0xff] %v322_v25  ;;  %v419_v29 = vmul.f32 0.5, %v415_v26  ;;  %619 = vst [vmem:[#allocation17] sm:$0xff] %v415_v26 }
 0x200   :  { %v420_v30 = vmul.f32 1.442695, %v419_v29 }
 0x202   :  { %945 = vpow2.f32 %v420_v30 }
 0x20f   :  { %v946_v32 = vpop.eup %945 }
 0x210   :  { %v422_v33 = vmul.f32 %v946_v32, %v418_v31 }
 0x212   :  { %v423_v34 = vadd.f32 %v422_v33, %v322_v25 }
 0x214   :  { %894 = vmatmul.mubr.f32.vlgmr.msra.gmra.mxu1 %v423_v34 }
 0x2d4   :  { %v513_v39 = vpop.f32.mrf.mxu1 }
 0x2d5   :  { %v514_v40 = vadd.f32 %v668_v38, %v513_v39 }
 0x2d6   :  { %v895_v41 = vpop.f32.mrf.mxu1 }
 0x2d7   :  { %v517_v42 = vmax.f32 %v514_v40, 0.0 }
 0x2d9   :  { %929 = vmatmul.mubr.f32.vlgmr.msra.gmra.mxu0 %v517_v42 }
 0x2da   :  { %1102 = shalt.err (!%p1099_p11)
}
 0x2db   :  { %639 = dma.vmem_to_hbm [thread:$0]  %s637_s4, 128, %s1415_s13, [#allocation16]  }
 0x2dc   :  { %s1175_s9 = smov [#allocation17]  }
 0x2dd   :  { %s646_s19 = sshll.u32 %s1175_s9, 4  ;;  %s647_s19 = int_to_ptr.vmem [resolvable:$true] %s646_s19 }
 0x2de   :  { %s1111_s8 = scalar_lea.vmem %s647_s19, 128  ;;  %p1116_p13 = scmp.lt.s32.totalorder %s647_s19, %s647_s19 }
 0x2df   :  { %p1112_p12 = scmp.ne.s32.totalorder %s647_s19, %s1111_s8  ;;  %p1117_p0 = scmp.lt.s32.totalorder %s1111_s8, %s1111_s8 }
 0x2e1   :  { %p1118_p1 = por %p1117_p0, %p1116_p13 }
 0x2e3   :  { %p1119_p2 = pnand %p1118_p1, %p1112_p12 }
 0x2e5   :  { %1122 = shalt.err (!%p1119_p2)
}
 0x2e6   :  { %649 = dma.vmem_to_hbm [thread:$0]  %s647_s19, 128, %s1416_s14, [#allocation16]   ;;  %v669_v0 = vld [vmem:[%s1413_s11] ss:$0 sm:$0xff] }
 0x2e7   :  { %s1176_s13 = smov [#allocation14]  }
 0x2e8   :  { %s626_s0 = sshll.u32 %s1176_s13, 4  ;;  %s627_s0 = int_to_ptr.vmem [resolvable:$true] %s626_s0 }
 0x2e9   :  { %s1131_s26 = scalar_lea.vmem %s627_s0, 128  ;;  %p1136_p4 = scmp.lt.s32.totalorder %s627_s0, %s627_s0 }
 0x2ea   :  { %p1132_p3 = scmp.ne.s32.totalorder %s627_s0, %s1131_s26  ;;  %p1137_p5 = scmp.lt.s32.totalorder %s1131_s26, %s1131_s26 }
 0x2ec   :  { %p1138_p6 = por %p1137_p5, %p1136_p4 }
 0x2ee   :  { %p1139_p7 = pnand %p1138_p6, %p1132_p3 }
 0x399   :  { %v607_v43 = vpop.f32.mrf.mxu0 }
 0x39a   :  { %v608_v44 = vadd.f32 %v669_v0, %v607_v43 }
 0x39b   :  { %v930_v45 = vpop.f32.mrf.mxu0 }
 0x39c   :  { %v670_v46 = vmul.f32 -1.442695, %v608_v44 }
 0x39e   :  { %947 = vpow2.f32 %v670_v46 }
 0x3ab   :  { %v948_v47 = vpop.eup %947 }
 0x3ac   :  { %v614_v48 = vadd.f32 1.0, %v948_v47 }
 0x3ae   :  { %949 = vrcp.f32 %v614_v48 }
 0x3bb   :  { %v950_v49 = vpop.eup %949 }
 0x3bc   :  { %617 = vst [vmem:[#allocation14] sm:$0xff] %v950_v49 }
 0x3bd   :  { %1142 = shalt.err (!%p1139_p7)
}
 0x3be   :  { %629 = dma.vmem_to_hbm [thread:$0]  %s627_s0, 128, %s1414_s12, [#allocation4]  }
 0x3bf   :  { %1159 = dma.done.wait [#allocation4], 128  }
 0x3c0   :  { %1160 = vsyncadd [#allocation4], 4294967168 }
 0x3c1   :  { %1161 = dma.done.wait [#allocation16], 256  }
 0x3c2   :  { %1162 = vsyncadd [#allocation16], 4294967040 }
 0x3c3   :  { %659 = vsyncpa [#allocation3], 1 }
 0x3c4   :  { %660 = vsyncpa [#allocation6], 1 }
 0x3c5   :  { %661 = vsyncpa [#allocation9], 1 }
 0x3c6   :  { %662 = vsyncpa [#allocation12], 1 }
 0x3c7   :  { %663 = vsyncpa [#allocation4], 1 }
 0x3c8   :  { %664 = vsyncpa [#allocation16], 1 }

</bundles_post_ra>
